<compile_context>
chip_gen: v7x
topology: tpu7x:2x2x1
jax: 0.10.0
libtpu: 0.0.40
codegen_flags: <defaults>
</compile_context>

<pallas_src>
import functools

import jax
import jax.numpy as jnp
from jax.experimental import pallas as pl
from jax.experimental.pallas import tpu as pltpu


def _lgn_atom_level_kernel(tau_in, tau_pos, op_dtype,
                           a_full_ref, a_tile_ref, e_ref,
                           w_in_ref, w_ag_ref, w_sq_ref, out_ref):
    # a_full_ref: (2, tau_in, N)        -- all atoms (j axis), lane-dense
    # a_tile_ref: (2, tau_in, Nt)       -- i-tile of atoms
    # e_ref:      (2, tau_pos, N, Nt)   -- edge[b, i, j, c2] stored as [c2, j, i]
    # w_in_ref:   (2, K, tau_in)
    # w_ag_ref:   (2, tau_pos, K, tau_in)   [x, c2, k, c1] = W_ag[x, k, c1, c2]
    # w_sq_ref:   (2, tau_in,  K, tau_in)   [x, c2, k, c1] = W_sq[x, k, c1, c2]
    # out_ref:    (2, K, Nt)
    f32 = jnp.float32
    dot = functools.partial(jnp.dot, preferred_element_type=f32)

    afr = a_full_ref[0, :, :]
    afi = a_full_ref[1, :, :]
    atr = a_tile_ref[0, :, :]
    ati = a_tile_ref[1, :, :]

    # ---- CatMix of the raw atom reps: W_in @ a_tile (complex) ----
    wir = w_in_ref[0, :, :]
    wii = w_in_ref[1, :, :]
    out_re = dot(wir, atr) - dot(wii, ati)          # (K, Nt) f32 accumulator
    out_im = dot(wir, ati) + dot(wii, atr)

    # ---- CGProduct(atom, atom) fused with W_sq ----
    # out_sq[k,i] = sum_{c2} (W_sq[:, :, c2] @ a)[k,i] * a[c2,i]   (complex)
    for c2 in range(tau_in):
        wr = w_sq_ref[0, c2, :, :]                  # (K, tau_in)
        wi = w_sq_ref[1, c2, :, :]
        tr = dot(wr, atr) - dot(wi, ati)            # (K, Nt)
        ti = dot(wr, ati) + dot(wi, atr)
        ar = atr[c2:c2 + 1, :].astype(f32)          # (1, Nt) sublane-broadcast row
        ai = ati[c2:c2 + 1, :].astype(f32)
        out_re += tr * ar - ti * ai
        out_im += tr * ai + ti * ar

    # ---- CGProduct(atom, edge, aggregate=True) fused with W_ag ----
    # out_ag[k,i] = sum_{c2,j} (W_ag[:, :, c2] @ a_full)[k,j] * edge_T[c2,j,i]   (complex)
    for c2 in range(tau_pos):
        wr = w_ag_ref[0, c2, :, :]                  # (K, tau_in)
        wi = w_ag_ref[1, c2, :, :]
        pr = dot(wr, afr) - dot(wi, afi)            # (K, N) f32
        pi = dot(wr, afi) + dot(wi, afr)
        er = e_ref[0, c2, :, :]                     # (N, Nt) -- j rows, i lanes
        ei = e_ref[1, c2, :, :]
        pr_c = pr.astype(op_dtype)
        pi_c = pi.astype(op_dtype)
        ps_c = (pr + pi).astype(op_dtype)
        # Gauss 3-multiplication complex matmul over the big contraction axis j.
        t1 = dot(pr_c, er)                          # (K, Nt)
        t2 = dot(pi_c, ei)
        t3 = dot(ps_c, er + ei)
        out_re += t1 - t2
        out_im += t3 - t1 - t2

    out_ref[0, :, :] = out_re.astype(out_ref.dtype)
    out_ref[1, :, :] = out_im.astype(out_ref.dtype)


def lgn_atom_level_forward(atom_reps, edge_reps, mask, weights, *,
                           tile_n=128, operand_dtype=None):
    """LGNAtomLevel.forward (maxdim=1).

    atom_reps: (2, B, N, tau_in)   edge_reps: (2, B, N, N, tau_pos)
    weights:   (2, K, tau_cat) with tau_cat = tau_in*tau_pos + tau_in + tau_in**2
    mask is unused (as in the reference forward()).
    operand_dtype: set to jnp.bfloat16 on v6e/v7x for the fast MXU path (f32 accumulation).
    """
    del mask  # unused in the PyTorch forward as well
    two, B, N, tau_in = atom_reps.shape
    assert two == 2
    tau_pos = edge_reps.shape[-1]
    _, K, tau_cat = weights.shape
    tau_ag = tau_in * tau_pos
    tau_sq = tau_in * tau_in
    assert tau_cat == tau_ag + tau_in + tau_sq

    op_dtype = jnp.dtype(operand_dtype) if operand_dtype is not None else jnp.dtype(jnp.float32)

    # ---- i-tile: full N when small, 128-aligned tiles otherwise ----
    if N <= tile_n:
        tile, n_pad = N, N
    else:
        tile = tile_n                                   # multiple of 128
        n_pad = pl.cdiv(N, tile) * tile
    n_tiles = n_pad // tile

    # ---- lane-dense layouts (large N axis last), done once outside the kernel ----
    atom_t = jnp.transpose(atom_reps, (0, 1, 3, 2)).astype(op_dtype)     # (2,B,tau_in,N)
    edge_t = jnp.transpose(edge_reps, (0, 1, 4, 3, 2)).astype(op_dtype)  # (2,B,tau_pos,Nj,Ni)
    if n_pad != N:
        atom_t = jnp.pad(atom_t, ((0, 0), (0, 0), (0, 0), (0, n_pad - N)))
        edge_t = jnp.pad(edge_t, ((0, 0), (0, 0), (0, 0), (0, n_pad - N), (0, n_pad - N)))

    # ---- split + pre-permute the CatMixReps weights (no in-kernel concat / transpose) ----
    w = weights.astype(op_dtype)
    w_ag = w[:, :, :tau_ag].reshape(2, K, tau_in, tau_pos)       # [x,k,c1,c2]
    w_in = w[:, :, tau_ag:tau_ag + tau_in]                       # [x,k,c]
    w_sq = w[:, :, tau_ag + tau_in:].reshape(2, K, tau_in, tau_in)
    w_ag_arr = jnp.transpose(w_ag, (0, 3, 1, 2))                 # (2, tau_pos, K, tau_in)
    w_sq_arr = jnp.transpose(w_sq, (0, 3, 1, 2))                 # (2, tau_in,  K, tau_in)

    kernel = functools.partial(_lgn_atom_level_kernel, tau_in, tau_pos, op_dtype)

    # explicit VMEM budget: double-buffered edge tile dominates
    isz = op_dtype.itemsize
    per_step = (2 * tau_pos * n_pad * tile
                + 2 * tau_in * (n_pad + tile)
                + 2 * K * tile) * isz + 2 * K * tile * 4
    vmem_limit = int(min(100 * 2 ** 20, max(16 * 2 ** 20, 4 * per_step)))

    out_t = pl.pallas_call(
        kernel,
        out_shape=jax.ShapeDtypeStruct((2, B, K, n_pad), jnp.float32),
        grid=(B, n_tiles),
        in_specs=[
            pl.BlockSpec((2, None, tau_in, n_pad), lambda b, it: (0, b, 0, 0)),
            pl.BlockSpec((2, None, tau_in, tile), lambda b, it: (0, b, 0, it)),
            pl.BlockSpec((2, None, tau_pos, n_pad, tile), lambda b, it: (0, b, 0, 0, it)),
            pl.BlockSpec((2, K, tau_in), lambda b, it: (0, 0, 0)),
            pl.BlockSpec((2, tau_pos, K, tau_in), lambda b, it: (0, 0, 0, 0)),
            pl.BlockSpec((2, tau_in, K, tau_in), lambda b, it: (0, 0, 0, 0)),
        ],
        out_specs=pl.BlockSpec((2, None, K, tile), lambda b, it: (0, b, 0, it)),
        compiler_params=pltpu.CompilerParams(
            dimension_semantics=("parallel", "parallel"),
            vmem_limit_bytes=vmem_limit,
        ),
    )(atom_t, atom_t, edge_t, w_in, w_ag_arr, w_sq_arr)

    # back to the reference layout: (2, B, N, num_channels)
    return jnp.transpose(out_t[:, :, :, :N], (0, 1, 3, 2))


if __name__ == "__main__":
    # Small, module-consistent shapes
    B, N = 2, 8                     # batch, atoms
    tau_in, tau_pos = 3, 2          # scalar-irrep channel counts
    num_channels = 4
    level_gain = 1.0                # CatMixReps gain
    tau_ag = tau_in * tau_pos
    tau_sq = tau_in * tau_in
    tau_cat = tau_ag + tau_in + tau_sq

    key = jax.random.PRNGKey(0)
    k_a, k_e, k_w = jax.random.split(key, 3)
    atom_reps = jax.random.normal(k_a, (2, B, N, tau_in), dtype=jnp.float32)
    edge_reps = jax.random.normal(k_e, (2, B, N, N, tau_pos), dtype=jnp.float32)
    mask = jnp.ones((B, N), dtype=bool)
    # deterministic 'randn'-style complex mixing weights (CatMixReps)
    weights = (level_gain / (tau_cat ** 0.5)) * jax.random.normal(
        k_w, (2, num_channels, tau_cat), dtype=jnp.float32)

    # plain-JAX reference (complex arithmetic)
    a = atom_reps[0] + 1j * atom_reps[1]
    e = edge_reps[0] + 1j * edge_reps[1]
    w = weights[0] + 1j * weights[1]
    ag = jnp.einsum('bjc,bijd->bicd', a, e).reshape(B, N, tau_ag)
    sq = (a[..., :, None] * a[..., None, :]).reshape(B, N, tau_sq)
    cat = jnp.concatenate([ag, a, sq], axis=-1)
    ref = jnp.einsum('bnc,kc->bnk', cat, w)
    ref = jnp.stack([ref.real, ref.imag], axis=0).astype(jnp.float32)

    # f32 MXU-operand path (exact)
    out = lgn_atom_level_forward(atom_reps, edge_reps, mask, weights)
    out = jax.block_until_ready(out)
    assert out.shape == (2, B, N, num_channels)
    assert jnp.allclose(out, ref, atol=1e-4, rtol=1e-4), float(jnp.max(jnp.abs(out - ref)))

    # bf16 MXU-operand path (v6e/v7x fast path; f32 accumulation) — looser tolerance
    out_bf = lgn_atom_level_forward(atom_reps, edge_reps, mask, weights,
                                    operand_dtype=jnp.bfloat16)
    out_bf = jax.block_until_ready(out_bf)
    assert out_bf.shape == (2, B, N, num_channels)
    assert jnp.allclose(out_bf, ref, atol=0.15, rtol=0.15), \
        float(jnp.max(jnp.abs(out_bf - ref)))

    print("KERNEL_OK")
</pallas_src>

<mosaic_0001>
module attributes {stable_mosaic.version = 11 : i64} {
  func.func @_lgn_atom_level_kernel(%arg0: i32, %arg1: i32, %arg2: memref<2x1x3x8xf32, #tpu.memory_space<vmem>>, %arg3: memref<2x1x3x8xf32, #tpu.memory_space<vmem>>, %arg4: memref<2x1x2x8x8xf32, #tpu.memory_space<vmem>>, %arg5: memref<2x4x3xf32, #tpu.memory_space<vmem>>, %arg6: memref<2x2x4x3xf32, #tpu.memory_space<vmem>>, %arg7: memref<2x3x4x3xf32, #tpu.memory_space<vmem>>, %arg8: memref<2x1x4x8xf32, #tpu.memory_space<vmem>>) attributes {dimension_semantics = [#tpu.dimension_semantics<parallel>, #tpu.dimension_semantics<parallel>], iteration_bounds = array<i64: 2, 1>, scalar_prefetch = 0 : i64, scratch_operands = 0 : i64, tpu.core_type = #tpu.core_type<tc>, window_params = [{transform_indices = @transform_0, window_bounds = array<i64: 2, 1, 3, 8>}, {transform_indices = @transform_1, window_bounds = array<i64: 2, 1, 3, 8>}, {transform_indices = @transform_2, window_bounds = array<i64: 2, 1, 2, 8, 8>}, {pipeline_mode = #tpu.pipeline_mode<synchronous>, transform_indices = @transform_3, window_bounds = array<i64: 2, 4, 3>}, {pipeline_mode = #tpu.pipeline_mode<synchronous>, transform_indices = @transform_4, window_bounds = array<i64: 2, 2, 4, 3>}, {pipeline_mode = #tpu.pipeline_mode<synchronous>, transform_indices = @transform_5, window_bounds = array<i64: 2, 3, 4, 3>}, {transform_indices = @transform_6, window_bounds = array<i64: 2, 1, 4, 8>}]} {
    %c0 = arith.constant 0 : index
    %c0_0 = arith.constant 0 : index
    %c0_1 = arith.constant 0 : index
    %c0_2 = arith.constant 0 : index
    %0 = vector.load %arg2[%c0, %c0_0, %c0_1, %c0_2] : memref<2x1x3x8xf32, #tpu.memory_space<vmem>>, vector<1x1x3x8xf32>
    %1 = vector.shape_cast %0 : vector<1x1x3x8xf32> to vector<3x8xf32>
    %c1 = arith.constant 1 : index
    %c0_3 = arith.constant 0 : index
    %c0_4 = arith.constant 0 : index
    %c0_5 = arith.constant 0 : index
    %2 = vector.load %arg2[%c1, %c0_3, %c0_4, %c0_5] : memref<2x1x3x8xf32, #tpu.memory_space<vmem>>, vector<1x1x3x8xf32>
    %3 = vector.shape_cast %2 : vector<1x1x3x8xf32> to vector<3x8xf32>
    %c0_6 = arith.constant 0 : index
    %c0_7 = arith.constant 0 : index
    %c0_8 = arith.constant 0 : index
    %c0_9 = arith.constant 0 : index
    %4 = vector.load %arg3[%c0_6, %c0_7, %c0_8, %c0_9] : memref<2x1x3x8xf32, #tpu.memory_space<vmem>>, vector<1x1x3x8xf32>
    %5 = vector.shape_cast %4 : vector<1x1x3x8xf32> to vector<3x8xf32>
    %c1_10 = arith.constant 1 : index
    %c0_11 = arith.constant 0 : index
    %c0_12 = arith.constant 0 : index
    %c0_13 = arith.constant 0 : index
    %6 = vector.load %arg3[%c1_10, %c0_11, %c0_12, %c0_13] : memref<2x1x3x8xf32, #tpu.memory_space<vmem>>, vector<1x1x3x8xf32>
    %7 = vector.shape_cast %6 : vector<1x1x3x8xf32> to vector<3x8xf32>
    %c0_14 = arith.constant 0 : index
    %c0_15 = arith.constant 0 : index
    %c0_16 = arith.constant 0 : index
    %8 = vector.load %arg5[%c0_14, %c0_15, %c0_16] : memref<2x4x3xf32, #tpu.memory_space<vmem>>, vector<1x4x3xf32>
    %9 = vector.shape_cast %8 : vector<1x4x3xf32> to vector<4x3xf32>
    %c1_17 = arith.constant 1 : index
    %c0_18 = arith.constant 0 : index
    %c0_19 = arith.constant 0 : index
    %10 = vector.load %arg5[%c1_17, %c0_18, %c0_19] : memref<2x4x3xf32, #tpu.memory_space<vmem>>, vector<1x4x3xf32>
    %11 = vector.shape_cast %10 : vector<1x4x3xf32> to vector<4x3xf32>
    %cst = arith.constant dense<0.000000e+00> : vector<4x8xf32>
    %12 = tpu.matmul %9, %5, %cst {dimension_numbers = #tpu.dot_dimension_numbers<[1], [0], [0], [1], [0, 0, 1, 1], [], []>} : vector<4x3xf32>, vector<3x8xf32>, vector<4x8xf32> -> vector<4x8xf32>
    %cst_20 = arith.constant dense<0.000000e+00> : vector<4x8xf32>
    %13 = tpu.matmul %11, %7, %cst_20 {dimension_numbers = #tpu.dot_dimension_numbers<[1], [0], [0], [1], [0, 0, 1, 1], [], []>} : vector<4x3xf32>, vector<3x8xf32>, vector<4x8xf32> -> vector<4x8xf32>
    %14 = arith.subf %12, %13 : vector<4x8xf32>
    %cst_21 = arith.constant dense<0.000000e+00> : vector<4x8xf32>
    %15 = tpu.matmul %9, %7, %cst_21 {dimension_numbers = #tpu.dot_dimension_numbers<[1], [0], [0], [1], [0, 0, 1, 1], [], []>} : vector<4x3xf32>, vector<3x8xf32>, vector<4x8xf32> -> vector<4x8xf32>
    %cst_22 = arith.constant dense<0.000000e+00> : vector<4x8xf32>
    %16 = tpu.matmul %11, %5, %cst_22 {dimension_numbers = #tpu.dot_dimension_numbers<[1], [0], [0], [1], [0, 0, 1, 1], [], []>} : vector<4x3xf32>, vector<3x8xf32>, vector<4x8xf32> -> vector<4x8xf32>
    %17 = arith.addf %15, %16 : vector<4x8xf32>
    %c0_23 = arith.constant 0 : index
    %c0_24 = arith.constant 0 : index
    %c0_25 = arith.constant 0 : index
    %c0_26 = arith.constant 0 : index
    %18 = vector.load %arg7[%c0_23, %c0_24, %c0_25, %c0_26] : memref<2x3x4x3xf32, #tpu.memory_space<vmem>>, vector<1x1x4x3xf32>
    %19 = vector.shape_cast %18 : vector<1x1x4x3xf32> to vector<4x3xf32>
    %c1_27 = arith.constant 1 : index
    %c0_28 = arith.constant 0 : index
    %c0_29 = arith.constant 0 : index
    %c0_30 = arith.constant 0 : index
    %20 = vector.load %arg7[%c1_27, %c0_28, %c0_29, %c0_30] : memref<2x3x4x3xf32, #tpu.memory_space<vmem>>, vector<1x1x4x3xf32>
    %21 = vector.shape_cast %20 : vector<1x1x4x3xf32> to vector<4x3xf32>
    %cst_31 = arith.constant dense<0.000000e+00> : vector<4x8xf32>
    %22 = tpu.matmul %19, %5, %cst_31 {dimension_numbers = #tpu.dot_dimension_numbers<[1], [0], [0], [1], [0, 0, 1, 1], [], []>} : vector<4x3xf32>, vector<3x8xf32>, vector<4x8xf32> -> vector<4x8xf32>
    %cst_32 = arith.constant dense<0.000000e+00> : vector<4x8xf32>
    %23 = tpu.matmul %21, %7, %cst_32 {dimension_numbers = #tpu.dot_dimension_numbers<[1], [0], [0], [1], [0, 0, 1, 1], [], []>} : vector<4x3xf32>, vector<3x8xf32>, vector<4x8xf32> -> vector<4x8xf32>
    %24 = arith.subf %22, %23 : vector<4x8xf32>
    %cst_33 = arith.constant dense<0.000000e+00> : vector<4x8xf32>
    %25 = tpu.matmul %19, %7, %cst_33 {dimension_numbers = #tpu.dot_dimension_numbers<[1], [0], [0], [1], [0, 0, 1, 1], [], []>} : vector<4x3xf32>, vector<3x8xf32>, vector<4x8xf32> -> vector<4x8xf32>
    %cst_34 = arith.constant dense<0.000000e+00> : vector<4x8xf32>
    %26 = tpu.matmul %21, %5, %cst_34 {dimension_numbers = #tpu.dot_dimension_numbers<[1], [0], [0], [1], [0, 0, 1, 1], [], []>} : vector<4x3xf32>, vector<3x8xf32>, vector<4x8xf32> -> vector<4x8xf32>
    %27 = arith.addf %25, %26 : vector<4x8xf32>
    %28 = vector.extract_strided_slice %5 {offsets = [0, 0], sizes = [1, 8], strides = [1, 1]} : vector<3x8xf32> to vector<1x8xf32>
    %29 = vector.extract_strided_slice %7 {offsets = [0, 0], sizes = [1, 8], strides = [1, 1]} : vector<3x8xf32> to vector<1x8xf32>
    %30 = vector.broadcast %28 : vector<1x8xf32> to vector<4x8xf32>
    %31 = arith.mulf %24, %30 : vector<4x8xf32>
    %32 = vector.broadcast %29 : vector<1x8xf32> to vector<4x8xf32>
    %33 = arith.mulf %27, %32 : vector<4x8xf32>
    %34 = arith.subf %31, %33 : vector<4x8xf32>
    %35 = arith.addf %14, %34 : vector<4x8xf32>
    %36 = vector.broadcast %29 : vector<1x8xf32> to vector<4x8xf32>
    %37 = arith.mulf %24, %36 : vector<4x8xf32>
    %38 = vector.broadcast %28 : vector<1x8xf32> to vector<4x8xf32>
    %39 = arith.mulf %27, %38 : vector<4x8xf32>
    %40 = arith.addf %37, %39 : vector<4x8xf32>
    %41 = arith.addf %17, %40 : vector<4x8xf32>
    %c0_35 = arith.constant 0 : index
    %c1_36 = arith.constant 1 : index
    %c0_37 = arith.constant 0 : index
    %c0_38 = arith.constant 0 : index
    %42 = vector.load %arg7[%c0_35, %c1_36, %c0_37, %c0_38] : memref<2x3x4x3xf32, #tpu.memory_space<vmem>>, vector<1x1x4x3xf32>
    %43 = vector.shape_cast %42 : vector<1x1x4x3xf32> to vector<4x3xf32>
    %c1_39 = arith.constant 1 : index
    %c1_40 = arith.constant 1 : index
    %c0_41 = arith.constant 0 : index
    %c0_42 = arith.constant 0 : index
    %44 = vector.load %arg7[%c1_39, %c1_40, %c0_41, %c0_42] : memref<2x3x4x3xf32, #tpu.memory_space<vmem>>, vector<1x1x4x3xf32>
    %45 = vector.shape_cast %44 : vector<1x1x4x3xf32> to vector<4x3xf32>
    %cst_43 = arith.constant dense<0.000000e+00> : vector<4x8xf32>
    %46 = tpu.matmul %43, %5, %cst_43 {dimension_numbers = #tpu.dot_dimension_numbers<[1], [0], [0], [1], [0, 0, 1, 1], [], []>} : vector<4x3xf32>, vector<3x8xf32>, vector<4x8xf32> -> vector<4x8xf32>
    %cst_44 = arith.constant dense<0.000000e+00> : vector<4x8xf32>
    %47 = tpu.matmul %45, %7, %cst_44 {dimension_numbers = #tpu.dot_dimension_numbers<[1], [0], [0], [1], [0, 0, 1, 1], [], []>} : vector<4x3xf32>, vector<3x8xf32>, vector<4x8xf32> -> vector<4x8xf32>
    %48 = arith.subf %46, %47 : vector<4x8xf32>
    %cst_45 = arith.constant dense<0.000000e+00> : vector<4x8xf32>
    %49 = tpu.matmul %43, %7, %cst_45 {dimension_numbers = #tpu.dot_dimension_numbers<[1], [0], [0], [1], [0, 0, 1, 1], [], []>} : vector<4x3xf32>, vector<3x8xf32>, vector<4x8xf32> -> vector<4x8xf32>
    %cst_46 = arith.constant dense<0.000000e+00> : vector<4x8xf32>
    %50 = tpu.matmul %45, %5, %cst_46 {dimension_numbers = #tpu.dot_dimension_numbers<[1], [0], [0], [1], [0, 0, 1, 1], [], []>} : vector<4x3xf32>, vector<3x8xf32>, vector<4x8xf32> -> vector<4x8xf32>
    %51 = arith.addf %49, %50 : vector<4x8xf32>
    %52 = vector.extract_strided_slice %5 {offsets = [1, 0], sizes = [1, 8], strides = [1, 1]} : vector<3x8xf32> to vector<1x8xf32>
    %53 = vector.extract_strided_slice %7 {offsets = [1, 0], sizes = [1, 8], strides = [1, 1]} : vector<3x8xf32> to vector<1x8xf32>
    %54 = vector.broadcast %52 : vector<1x8xf32> to vector<4x8xf32>
    %55 = arith.mulf %48, %54 : vector<4x8xf32>
    %56 = vector.broadcast %53 : vector<1x8xf32> to vector<4x8xf32>
    %57 = arith.mulf %51, %56 : vector<4x8xf32>
    %58 = arith.subf %55, %57 : vector<4x8xf32>
    %59 = arith.addf %35, %58 : vector<4x8xf32>
    %60 = vector.broadcast %53 : vector<1x8xf32> to vector<4x8xf32>
    %61 = arith.mulf %48, %60 : vector<4x8xf32>
    %62 = vector.broadcast %52 : vector<1x8xf32> to vector<4x8xf32>
    %63 = arith.mulf %51, %62 : vector<4x8xf32>
    %64 = arith.addf %61, %63 : vector<4x8xf32>
    %65 = arith.addf %41, %64 : vector<4x8xf32>
    %c0_47 = arith.constant 0 : index
    %c2 = arith.constant 2 : index
    %c0_48 = arith.constant 0 : index
    %c0_49 = arith.constant 0 : index
    %66 = vector.load %arg7[%c0_47, %c2, %c0_48, %c0_49] : memref<2x3x4x3xf32, #tpu.memory_space<vmem>>, vector<1x1x4x3xf32>
    %67 = vector.shape_cast %66 : vector<1x1x4x3xf32> to vector<4x3xf32>
    %c1_50 = arith.constant 1 : index
    %c2_51 = arith.constant 2 : index
    %c0_52 = arith.constant 0 : index
    %c0_53 = arith.constant 0 : index
    %68 = vector.load %arg7[%c1_50, %c2_51, %c0_52, %c0_53] : memref<2x3x4x3xf32, #tpu.memory_space<vmem>>, vector<1x1x4x3xf32>
    %69 = vector.shape_cast %68 : vector<1x1x4x3xf32> to vector<4x3xf32>
    %cst_54 = arith.constant dense<0.000000e+00> : vector<4x8xf32>
    %70 = tpu.matmul %67, %5, %cst_54 {dimension_numbers = #tpu.dot_dimension_numbers<[1], [0], [0], [1], [0, 0, 1, 1], [], []>} : vector<4x3xf32>, vector<3x8xf32>, vector<4x8xf32> -> vector<4x8xf32>
    %cst_55 = arith.constant dense<0.000000e+00> : vector<4x8xf32>
    %71 = tpu.matmul %69, %7, %cst_55 {dimension_numbers = #tpu.dot_dimension_numbers<[1], [0], [0], [1], [0, 0, 1, 1], [], []>} : vector<4x3xf32>, vector<3x8xf32>, vector<4x8xf32> -> vector<4x8xf32>
    %72 = arith.subf %70, %71 : vector<4x8xf32>
    %cst_56 = arith.constant dense<0.000000e+00> : vector<4x8xf32>
    %73 = tpu.matmul %67, %7, %cst_56 {dimension_numbers = #tpu.dot_dimension_numbers<[1], [0], [0], [1], [0, 0, 1, 1], [], []>} : vector<4x3xf32>, vector<3x8xf32>, vector<4x8xf32> -> vector<4x8xf32>
    %cst_57 = arith.constant dense<0.000000e+00> : vector<4x8xf32>
    %74 = tpu.matmul %69, %5, %cst_57 {dimension_numbers = #tpu.dot_dimension_numbers<[1], [0], [0], [1], [0, 0, 1, 1], [], []>} : vector<4x3xf32>, vector<3x8xf32>, vector<4x8xf32> -> vector<4x8xf32>
    %75 = arith.addf %73, %74 : vector<4x8xf32>
    %76 = vector.extract_strided_slice %5 {offsets = [2, 0], sizes = [1, 8], strides = [1, 1]} : vector<3x8xf32> to vector<1x8xf32>
    %77 = vector.extract_strided_slice %7 {offsets = [2, 0], sizes = [1, 8], strides = [1, 1]} : vector<3x8xf32> to vector<1x8xf32>
    %78 = vector.broadcast %76 : vector<1x8xf32> to vector<4x8xf32>
    %79 = arith.mulf %72, %78 : vector<4x8xf32>
    %80 = vector.broadcast %77 : vector<1x8xf32> to vector<4x8xf32>
    %81 = arith.mulf %75, %80 : vector<4x8xf32>
    %82 = arith.subf %79, %81 : vector<4x8xf32>
    %83 = arith.addf %59, %82 : vector<4x8xf32>
    %84 = vector.broadcast %77 : vector<1x8xf32> to vector<4x8xf32>
    %85 = arith.mulf %72, %84 : vector<4x8xf32>
    %86 = vector.broadcast %76 : vector<1x8xf32> to vector<4x8xf32>
    %87 = arith.mulf %75, %86 : vector<4x8xf32>
    %88 = arith.addf %85, %87 : vector<4x8xf32>
    %89 = arith.addf %65, %88 : vector<4x8xf32>
    %c0_58 = arith.constant 0 : index
    %c0_59 = arith.constant 0 : index
    %c0_60 = arith.constant 0 : index
    %c0_61 = arith.constant 0 : index
    %90 = vector.load %arg6[%c0_58, %c0_59, %c0_60, %c0_61] : memref<2x2x4x3xf32, #tpu.memory_space<vmem>>, vector<1x1x4x3xf32>
    %91 = vector.shape_cast %90 : vector<1x1x4x3xf32> to vector<4x3xf32>
    %c1_62 = arith.constant 1 : index
    %c0_63 = arith.constant 0 : index
    %c0_64 = arith.constant 0 : index
    %c0_65 = arith.constant 0 : index
    %92 = vector.load %arg6[%c1_62, %c0_63, %c0_64, %c0_65] : memref<2x2x4x3xf32, #tpu.memory_space<vmem>>, vector<1x1x4x3xf32>
    %93 = vector.shape_cast %92 : vector<1x1x4x3xf32> to vector<4x3xf32>
    %cst_66 = arith.constant dense<0.000000e+00> : vector<4x8xf32>
    %94 = tpu.matmul %91, %1, %cst_66 {dimension_numbers = #tpu.dot_dimension_numbers<[1], [0], [0], [1], [0, 0, 1, 1], [], []>} : vector<4x3xf32>, vector<3x8xf32>, vector<4x8xf32> -> vector<4x8xf32>
    %cst_67 = arith.constant dense<0.000000e+00> : vector<4x8xf32>
    %95 = tpu.matmul %93, %3, %cst_67 {dimension_numbers = #tpu.dot_dimension_numbers<[1], [0], [0], [1], [0, 0, 1, 1], [], []>} : vector<4x3xf32>, vector<3x8xf32>, vector<4x8xf32> -> vector<4x8xf32>
    %96 = arith.subf %94, %95 : vector<4x8xf32>
    %cst_68 = arith.constant dense<0.000000e+00> : vector<4x8xf32>
    %97 = tpu.matmul %91, %3, %cst_68 {dimension_numbers = #tpu.dot_dimension_numbers<[1], [0], [0], [1], [0, 0, 1, 1], [], []>} : vector<4x3xf32>, vector<3x8xf32>, vector<4x8xf32> -> vector<4x8xf32>
    %cst_69 = arith.constant dense<0.000000e+00> : vector<4x8xf32>
    %98 = tpu.matmul %93, %1, %cst_69 {dimension_numbers = #tpu.dot_dimension_numbers<[1], [0], [0], [1], [0, 0, 1, 1], [], []>} : vector<4x3xf32>, vector<3x8xf32>, vector<4x8xf32> -> vector<4x8xf32>
    %99 = arith.addf %97, %98 : vector<4x8xf32>
    %c0_70 = arith.constant 0 : index
    %c0_71 = arith.constant 0 : index
    %c0_72 = arith.constant 0 : index
    %c0_73 = arith.constant 0 : index
    %c0_74 = arith.constant 0 : index
    %100 = vector.load %arg4[%c0_70, %c0_71, %c0_72, %c0_73, %c0_74] : memref<2x1x2x8x8xf32, #tpu.memory_space<vmem>>, vector<1x1x1x8x8xf32>
    %101 = vector.shape_cast %100 : vector<1x1x1x8x8xf32> to vector<8x8xf32>
    %c1_75 = arith.constant 1 : index
    %c0_76 = arith.constant 0 : index
    %c0_77 = arith.constant 0 : index
    %c0_78 = arith.constant 0 : index
    %c0_79 = arith.constant 0 : index
    %102 = vector.load %arg4[%c1_75, %c0_76, %c0_77, %c0_78, %c0_79] : memref<2x1x2x8x8xf32, #tpu.memory_space<vmem>>, vector<1x1x1x8x8xf32>
    %103 = vector.shape_cast %102 : vector<1x1x1x8x8xf32> to vector<8x8xf32>
    %104 = arith.addf %96, %99 : vector<4x8xf32>
    %cst_80 = arith.constant dense<0.000000e+00> : vector<4x8xf32>
    %105 = tpu.matmul %96, %101, %cst_80 {dimension_numbers = #tpu.dot_dimension_numbers<[1], [0], [0], [1], [0, 0, 1, 1], [], []>} : vector<4x8xf32>, vector<8x8xf32>, vector<4x8xf32> -> vector<4x8xf32>
    %cst_81 = arith.constant dense<0.000000e+00> : vector<4x8xf32>
    %106 = tpu.matmul %99, %103, %cst_81 {dimension_numbers = #tpu.dot_dimension_numbers<[1], [0], [0], [1], [0, 0, 1, 1], [], []>} : vector<4x8xf32>, vector<8x8xf32>, vector<4x8xf32> -> vector<4x8xf32>
    %107 = arith.addf %101, %103 : vector<8x8xf32>
    %cst_82 = arith.constant dense<0.000000e+00> : vector<4x8xf32>
    %108 = tpu.matmul %104, %107, %cst_82 {dimension_numbers = #tpu.dot_dimension_numbers<[1], [0], [0], [1], [0, 0, 1, 1], [], []>} : vector<4x8xf32>, vector<8x8xf32>, vector<4x8xf32> -> vector<4x8xf32>
    %109 = arith.subf %105, %106 : vector<4x8xf32>
    %110 = arith.addf %83, %109 : vector<4x8xf32>
    %111 = arith.subf %108, %105 : vector<4x8xf32>
    %112 = arith.subf %111, %106 : vector<4x8xf32>
    %113 = arith.addf %89, %112 : vector<4x8xf32>
    %c0_83 = arith.constant 0 : index
    %c1_84 = arith.constant 1 : index
    %c0_85 = arith.constant 0 : index
    %c0_86 = arith.constant 0 : index
    %114 = vector.load %arg6[%c0_83, %c1_84, %c0_85, %c0_86] : memref<2x2x4x3xf32, #tpu.memory_space<vmem>>, vector<1x1x4x3xf32>
    %115 = vector.shape_cast %114 : vector<1x1x4x3xf32> to vector<4x3xf32>
    %c1_87 = arith.constant 1 : index
    %c1_88 = arith.constant 1 : index
    %c0_89 = arith.constant 0 : index
    %c0_90 = arith.constant 0 : index
    %116 = vector.load %arg6[%c1_87, %c1_88, %c0_89, %c0_90] : memref<2x2x4x3xf32, #tpu.memory_space<vmem>>, vector<1x1x4x3xf32>
    %117 = vector.shape_cast %116 : vector<1x1x4x3xf32> to vector<4x3xf32>
    %cst_91 = arith.constant dense<0.000000e+00> : vector<4x8xf32>
    %118 = tpu.matmul %115, %1, %cst_91 {dimension_numbers = #tpu.dot_dimension_numbers<[1], [0], [0], [1], [0, 0, 1, 1], [], []>} : vector<4x3xf32>, vector<3x8xf32>, vector<4x8xf32> -> vector<4x8xf32>
    %cst_92 = arith.constant dense<0.000000e+00> : vector<4x8xf32>
    %119 = tpu.matmul %117, %3, %cst_92 {dimension_numbers = #tpu.dot_dimension_numbers<[1], [0], [0], [1], [0, 0, 1, 1], [], []>} : vector<4x3xf32>, vector<3x8xf32>, vector<4x8xf32> -> vector<4x8xf32>
    %120 = arith.subf %118, %119 : vector<4x8xf32>
    %cst_93 = arith.constant dense<0.000000e+00> : vector<4x8xf32>
    %121 = tpu.matmul %115, %3, %cst_93 {dimension_numbers = #tpu.dot_dimension_numbers<[1], [0], [0], [1], [0, 0, 1, 1], [], []>} : vector<4x3xf32>, vector<3x8xf32>, vector<4x8xf32> -> vector<4x8xf32>
    %cst_94 = arith.constant dense<0.000000e+00> : vector<4x8xf32>
    %122 = tpu.matmul %117, %1, %cst_94 {dimension_numbers = #tpu.dot_dimension_numbers<[1], [0], [0], [1], [0, 0, 1, 1], [], []>} : vector<4x3xf32>, vector<3x8xf32>, vector<4x8xf32> -> vector<4x8xf32>
    %123 = arith.addf %121, %122 : vector<4x8xf32>
    %c0_95 = arith.constant 0 : index
    %c0_96 = arith.constant 0 : index
    %c1_97 = arith.constant 1 : index
    %c0_98 = arith.constant 0 : index
    %c0_99 = arith.constant 0 : index
    %124 = vector.load %arg4[%c0_95, %c0_96, %c1_97, %c0_98, %c0_99] : memref<2x1x2x8x8xf32, #tpu.memory_space<vmem>>, vector<1x1x1x8x8xf32>
    %125 = vector.shape_cast %124 : vector<1x1x1x8x8xf32> to vector<8x8xf32>
    %c1_100 = arith.constant 1 : index
    %c0_101 = arith.constant 0 : index
    %c1_102 = arith.constant 1 : index
    %c0_103 = arith.constant 0 : index
    %c0_104 = arith.constant 0 : index
    %126 = vector.load %arg4[%c1_100, %c0_101, %c1_102, %c0_103, %c0_104] : memref<2x1x2x8x8xf32, #tpu.memory_space<vmem>>, vector<1x1x1x8x8xf32>
    %127 = vector.shape_cast %126 : vector<1x1x1x8x8xf32> to vector<8x8xf32>
    %128 = arith.addf %120, %123 : vector<4x8xf32>
    %cst_105 = arith.constant dense<0.000000e+00> : vector<4x8xf32>
    %129 = tpu.matmul %120, %125, %cst_105 {dimension_numbers = #tpu.dot_dimension_numbers<[1], [0], [0], [1], [0, 0, 1, 1], [], []>} : vector<4x8xf32>, vector<8x8xf32>, vector<4x8xf32> -> vector<4x8xf32>
    %cst_106 = arith.constant dense<0.000000e+00> : vector<4x8xf32>
    %130 = tpu.matmul %123, %127, %cst_106 {dimension_numbers = #tpu.dot_dimension_numbers<[1], [0], [0], [1], [0, 0, 1, 1], [], []>} : vector<4x8xf32>, vector<8x8xf32>, vector<4x8xf32> -> vector<4x8xf32>
    %131 = arith.addf %125, %127 : vector<8x8xf32>
    %cst_107 = arith.constant dense<0.000000e+00> : vector<4x8xf32>
    %132 = tpu.matmul %128, %131, %cst_107 {dimension_numbers = #tpu.dot_dimension_numbers<[1], [0], [0], [1], [0, 0, 1, 1], [], []>} : vector<4x8xf32>, vector<8x8xf32>, vector<4x8xf32> -> vector<4x8xf32>
    %133 = arith.subf %129, %130 : vector<4x8xf32>
    %134 = arith.addf %110, %133 : vector<4x8xf32>
    %135 = arith.subf %132, %129 : vector<4x8xf32>
    %136 = arith.subf %135, %130 : vector<4x8xf32>
    %137 = arith.addf %113, %136 : vector<4x8xf32>
    %c0_108 = arith.constant 0 : index
    %c0_109 = arith.constant 0 : index
    %c0_110 = arith.constant 0 : index
    %c0_111 = arith.constant 0 : index
    %138 = vector.load %arg8[%c0_108, %c0_109, %c0_110, %c0_111] : memref<2x1x4x8xf32, #tpu.memory_space<vmem>>, vector<1x1x4x8xf32>
    %139 = vector.shape_cast %138 : vector<1x1x4x8xf32> to vector<4x8xf32>
    %140 = vector.shape_cast %134 : vector<4x8xf32> to vector<1x1x4x8xf32>
    tpu.vector_store %arg8[%c0_108, %c0_109, %c0_110, %c0_111], %140 {strides = array<i32>} : memref<2x1x4x8xf32, #tpu.memory_space<vmem>>, vector<1x1x4x8xf32>,
    %c1_112 = arith.constant 1 : index
    %c0_113 = arith.constant 0 : index
    %c0_114 = arith.constant 0 : index
    %c0_115 = arith.constant 0 : index
    %141 = vector.load %arg8[%c1_112, %c0_113, %c0_114, %c0_115] : memref<2x1x4x8xf32, #tpu.memory_space<vmem>>, vector<1x1x4x8xf32>
    %142 = vector.shape_cast %141 : vector<1x1x4x8xf32> to vector<4x8xf32>
    %143 = vector.shape_cast %137 : vector<4x8xf32> to vector<1x1x4x8xf32>
    tpu.vector_store %arg8[%c1_112, %c0_113, %c0_114, %c0_115], %143 {strides = array<i32>} : memref<2x1x4x8xf32, #tpu.memory_space<vmem>>, vector<1x1x4x8xf32>,
    return
  }
  func.func @transform_0(%arg0: i32, %arg1: i32) -> (i32, i32, i32, i32) {
    %c0_i32 = arith.constant 0 : i32
    %c0_i32_0 = arith.constant 0 : i32
    %c0_i32_1 = arith.constant 0 : i32
    %c0_i32_2 = arith.constant 0 : i32
    return %c0_i32, %arg0, %c0_i32_0, %c0_i32_1 : i32, i32, i32, i32
  }
  func.func @transform_1(%arg0: i32, %arg1: i32) -> (i32, i32, i32, i32) {
    %c0_i32 = arith.constant 0 : i32
    %c0_i32_0 = arith.constant 0 : i32
    %c0_i32_1 = arith.constant 0 : i32
    return %c0_i32, %arg0, %c0_i32_0, %arg1 : i32, i32, i32, i32
  }
  func.func @transform_2(%arg0: i32, %arg1: i32) -> (i32, i32, i32, i32, i32) {
    %c0_i32 = arith.constant 0 : i32
    %c0_i32_0 = arith.constant 0 : i32
    %c0_i32_1 = arith.constant 0 : i32
    %c0_i32_2 = arith.constant 0 : i32
    return %c0_i32, %arg0, %c0_i32_0, %c0_i32_1, %arg1 : i32, i32, i32, i32, i32
  }
  func.func @transform_3(%arg0: i32, %arg1: i32) -> (i32, i32, i32) {
    %c0_i32 = arith.constant 0 : i32
    %c0_i32_0 = arith.constant 0 : i32
    %c0_i32_1 = arith.constant 0 : i32
    %c0_i32_2 = arith.constant 0 : i32
    return %c0_i32, %c0_i32_0, %c0_i32_1 : i32, i32, i32
  }
  func.func @transform_4(%arg0: i32, %arg1: i32) -> (i32, i32, i32, i32) {
    %c0_i32 = arith.constant 0 : i32
    %c0_i32_0 = arith.constant 0 : i32
    %c0_i32_1 = arith.constant 0 : i32
    %c0_i32_2 = arith.constant 0 : i32
    %c0_i32_3 = arith.constant 0 : i32
    return %c0_i32, %c0_i32_0, %c0_i32_1, %c0_i32_2 : i32, i32, i32, i32
  }
  func.func @transform_5(%arg0: i32, %arg1: i32) -> (i32, i32, i32, i32) {
    %c0_i32 = arith.constant 0 : i32
    %c0_i32_0 = arith.constant 0 : i32
    %c0_i32_1 = arith.constant 0 : i32
    %c0_i32_2 = arith.constant 0 : i32
    %c0_i32_3 = arith.constant 0 : i32
    return %c0_i32, %c0_i32_0, %c0_i32_1, %c0_i32_2 : i32, i32, i32, i32
  }
  func.func @transform_6(%arg0: i32, %arg1: i32) -> (i32, i32, i32, i32) {
    %c0_i32 = arith.constant 0 : i32
    %c0_i32_0 = arith.constant 0 : i32
    %c0_i32_1 = arith.constant 0 : i32
    return %c0_i32, %arg0, %c0_i32_0, %arg1 : i32, i32, i32, i32
  }
}

</mosaic_0001>

<bundles_post_ra>
// kernel: tpu_custom_call.1
= control target key start
LH: loop header
LB: loop body
LE: loop exit
PB: predicated region body
PF: predicated region fallthrough
CT: control target
= control target key end

     0   :  { %11 = vsyncpa [#allocation6], 0  ;;  %s3720_s0 = inlined_call_operand.vmem [shape: f32[2,2,3,8], index: 0, kind: input, shape index: {}]   ;;  %s3721_s1 = inlined_call_operand.vmem [shape: f32[2,2,3,8], index: 1, kind: input, shape index: {}]   ;;  %s3722_s2 = inlined_call_operand.vmem [shape: f32[2,2,2,8,8], index: 2, kind: input, shape index: {}]   ;;  %s3723_s3 = inlined_call_operand.vmem [shape: f32[2,4,3], index: 3, kind: input, shape index: {}]   ;;  %s3724_s4 = inlined_call_operand.vmem [shape: f32[2,2,4,3], index: 4, kind: input, shape index: {}]   ;;  %s3725_s5 = inlined_call_operand.vmem [shape: f32[2,3,4,3], index: 5, kind: input, shape index: {}]   ;;  %s3726_s6 = inlined_call_operand.hbm [shape: f32[2,2,4,8], index: 6, kind: output, shape index: {}]  }
   0x1   :  { %13 = vsyncpa [#allocation6 + $0x1], 0  ;;  %s3343_s21 = smov 0   ;;  %s3345_s22 = smov 0  }
   0x2   :  { %s3347_s23 = smov 0   ;;  %s3349_s24 = smov 0  }
   0x3   :  { %s3351_s25 = smov 0   ;;  %s3353_s26 = smov 0  }
   0x4 LB: > { %s2852_s27 = sadd.s32 4294967295, %s3300_s26   ;;  %s2853_s28 = sadd.s32 4294967294, %s3300_s26   ;;  %s3300_s26 = sphi %s3353_s26, %s19_s26   ;;  %s3296_s25 = sphi %s3351_s25, %s3734_s25   ;;  %s3292_s24 = sphi %s3349_s24, %s3733_s24   ;;  %s3288_s23 = sphi %s3347_s23, %s3732_s23   ;;  %s3284_s22 = sphi %s3345_s22, %s3731_s22   ;;  %s3280_s21 = sphi %s3343_s21, %s3730_s21  }
   0x5   : > { %s31_s29 = sadd.s32 1, %s3296_s25  ;;  %s38_s30 = sadd.s32 1, %s3288_s23 }
   0x6   : > { %p33_p0 = scmp.ge.s32.totalorder %s31_s29, 2  ;;  %p45_p1 = scmp.ne.s32.totalorder %s3288_s23, %s3284_s22 }
   0x7   : > { %p46_p2 = scmp.eq.s32.totalorder %s3300_s26, 0  ;;  %p196_p3 = scmp.eq.s32.totalorder %s2852_s27, 1 }
   0x8   : > { %s3736_s29 = smov (%p33_p0, %s31_s29), 0  ;;  %p201_p6 = scmp.ne.s32.totalorder %s3284_s22, %s3280_s21 }
   0x9   : > { %p3382_p4 = por %p46_p2, %p45_p1  ;;  %p3386_p5 = por %p196_p3, %p45_p1 }
   0xa   : > { %s35_s9 = ssub.s32 %s3296_s25, %s3736_s29  ;;  %p202_p8 = scmp.eq.s32.totalorder %s2853_s28, 1 }
   0xb   : > { %p36_p7 = scmp.eq.s32.totalorder %s35_s9, 0  ;;  %p2855_p10 = scmp.ge.s32.totalorder %s3300_s26, 2 }
   0xc   : > { %p3397_p9 = por %p202_p8, %p201_p6 }
   0xd   : > { %s3395_s10 = scalar_select %p36_p7, %s3288_s23, %s38_s30  }
   0xe   : > { %227 = sbr.rel (%p2855_p10) target bundleno = 42 (0x2a), region = 28 }
  0x15   : > { %230 = sbr.rel (!%p3382_p4) target bundleno = 28 (0x1c), region = 32  ;;  %s232_s12 = sand.u32 (%p3382_p4), 1, %s3288_s23  }
  0x16   : > { %s2857_s13 = sshll.u32 (%p3382_p4), %s3296_s25, 2  ;;  %s2856_s14 = sshll.u32 (%p3382_p4), %s232_s12, 3 }
  0x17   : > { %s236_s17 = scalar_lea.vmem (%p3382_p4), %s3720_s0, %s2857_s13  ;;  %s234_s18 = scalar_lea.vmem (%p3382_p4), [#allocation2], %s2856_s14 }
  0x18   : > { %v252_v0 = vld [vmem:[%s236_s17] sm:$0xf] (%p3382_p4)  ;;  %v254_v1 = vld [vmem:[%s236_s17 + $0x8] sm:$0xf] (%p3382_p4) }
  0x19   : > { %253 = vst [vmem:[%s234_s18] sm:$0xf] (%p3382_p4), %v252_v0  ;;  %255 = vst [vmem:[%s234_s18 + $0x4] sm:$0xf] (%p3382_p4), %v254_v1 }
  0x1c PF: > { %282 = sbr.rel (!%p3382_p4) target bundleno = 35 (0x23), region = 73  ;;  %s284_s19 = sand.u32 (%p3382_p4), 1, %s3288_s23  }
  0x1d   : > { %s2859_s20 = sshll.u32 (%p3382_p4), %s3296_s25, 2  ;;  %s2858_s27 = sshll.u32 (%p3382_p4), %s284_s19, 3 }
  0x1e   : > { %s289_s9 = scalar_lea.vmem (%p3382_p4), %s3721_s1, %s2859_s20  ;;  %s286_s12 = scalar_lea.vmem (%p3382_p4), [#allocation3], %s2858_s27 }
  0x1f   : > { %v305_v2 = vld [vmem:[%s289_s9] sm:$0xf] (%p3382_p4)  ;;  %v307_v3 = vld [vmem:[%s289_s9 + $0x8] sm:$0xf] (%p3382_p4) }
  0x20   : > { %306 = vst [vmem:[%s286_s12] sm:$0xf] (%p3382_p4), %v305_v2  ;;  %308 = vst [vmem:[%s286_s12 + $0x4] sm:$0xf] (%p3382_p4), %v307_v3 }
  0x23 PF: > { %335 = sbr.rel (!%p3382_p4) target bundleno = 42 (0x2a), region = 114  ;;  %s337_s13 = sand.u32 (%p3382_p4), 1, %s3288_s23  }
  0x24   : > { %s2941_s14 = sshll.u32 (%p3382_p4), %s3296_s25, 4  ;;  %s2860_s15 = sshll.u32 (%p3382_p4), %s337_s13, 5 }
  0x25   : > { %s343_s18 = scalar_lea.vmem (%p3382_p4), %s3722_s2, %s2941_s14  ;;  %s339_s19 = scalar_lea.vmem (%p3382_p4), [#allocation4], %s2860_s15 }
  0x26   : > { %v377_v4 = vld [vmem:[%s343_s18] sm:$0xff] (%p3382_p4)  ;;  %v379_v5 = vld [vmem:[%s343_s18 + $0x8] sm:$0xff] (%p3382_p4) }
  0x27   : > { %v381_v6 = vld [vmem:[%s343_s18 + $0x20] sm:$0xff] (%p3382_p4)  ;;  %378 = vst [vmem:[%s339_s19] sm:$0xff] (%p3382_p4), %v377_v4  ;;  %380 = vst [vmem:[%s339_s19 + $0x8] sm:$0xff] (%p3382_p4), %v379_v5  ;;  %v383_v7 = vld [vmem:[%s343_s18 + $0x28] sm:$0xff] (%p3382_p4) }
  0x28   : > { %382 = vst [vmem:[%s339_s19 + $0x10] sm:$0xff] (%p3382_p4), %v381_v6  ;;  %384 = vst [vmem:[%s339_s19 + $0x18] sm:$0xff] (%p3382_p4), %v383_v7 }
  0x2a PF: > { %p2863_p11 = scmp.ge.s32.totalorder %s3300_s26, 1  ;;  %p389_p12 = scmp.lt.s32.totalorder %s3300_s26, 3 }
  0x2c   : > { %p390_p13 = pnand %p2863_p11, %p389_p12 }
  0x2d   : > { %s3428_s7 = sand.u32 (!%p390_p13), 1, %s3284_s22   ;;  %v3302_v8 = vmov (!%p390_p13), 0.0   ;;  %vm460_vm0 = vcmask (!%p390_p13), 1042432   ;;  %vm3303_vm1 = vmmov (!%p390_p13), 0   ;;  %v453_v9 = vld [vmem:[%s3723_s3] sm:$0xf] (!%p390_p13)  ;;  %v1041_v34 = vlaneseq (!%p390_p13) }
  0x2e   : > { %393 = sbr.rel (%p390_p13) target bundleno = 782 (0x30e), region = 152  ;;  %3002 = vmatprep.subr.mxu0 (!%p390_p13), %v3302_v8  ;;  %s3432_s20 = sshll.u32 (!%p390_p13), %s3428_s7, 3  ;;  %3004 = vmatprep.mubr.msk.f32.mxu0 (!%p390_p13), %vm3303_vm1, %v3302_v8  ;;  %vm456_vm2 = vcmask (!%p390_p13), 23552   ;;  %v2870_v12 = vld [vmem:[%s3723_s3 + $0x4] sm:$0xf] (!%p390_p13)  ;;  %vm1971_vm3 = vcmask (!%p390_p13), 64512  }
  0x2f   : > { %3007 = vmatprep.subr.mxu1 (!%p390_p13), %v3302_v8  ;;  %3009 = vmatprep.mubr.msk.f32.mxu1 (!%p390_p13), %vm3303_vm1, %v3302_v8  ;;  %s405_s30 = scalar_lea.vmem (!%p390_p13), [#allocation3], %s3432_s20  ;;  %v751_v13 = vld [vmem:[%s3725_s5] sm:$0xf] (!%p390_p13)  ;;  %v2879_v14 = vld [vmem:[%s3725_s5 + $0xc] sm:$0xf] (!%p390_p13)  ;;  %s398_s13 = scalar_lea.vmem (!%p390_p13), [#allocation2], %s3432_s20 }
  0x30   : > { %v3443_v10 = vld [vmem:[%s405_s30] sm:$0x7] (!%p390_p13)  ;;  %v3445_v11 = vld [vmem:[%s405_s30 + $0x4] sm:$0x7] (!%p390_p13)  ;;  %v2888_v15 = vld [vmem:[%s3725_s5 + $0x4] sm:$0xf] (!%p390_p13) }
  0x31   : > { %3003 = vmatpush3.msk.msra.mxu0 (!%p390_p13), %vm460_vm0, %v3443_v10  ;;  %3008 = vmatpush3.msk.msra.mxu1 (!%p390_p13), %vm460_vm0, %v3445_v11  ;;  %v2889_v16 = vld [vmem:[%s3725_s5 + $0x10] sm:$0xf] (!%p390_p13)  ;;  %v2898_v17 = vld [vmem:[%s3725_s5 + $0x8] sm:$0xf] (!%p390_p13)  ;;  %v2899_v18 = vld [vmem:[%s3725_s5 + $0x14] sm:$0xf] (!%p390_p13) }
  0x32   : > { %3005 = vmatmul.mubr.msk.f32.vlgmr.msra.gmra.mrb[0].mxu0 (!%p390_p13), %vm456_vm2, %v453_v9  ;;  %3012 = vmatprep.subr.mxu0 (!%p390_p13), %v3302_v8  ;;  %v3542_v19 = vld [vmem:[%s398_s13] sm:$0x7] (!%p390_p13)  ;;  %v3558_v21 = vld [vmem:[%s398_s13 + $0x4] sm:$0x7] (!%p390_p13)  ;;  %s2866_s18 = sshll.u32 (!%p390_p13), %s3428_s7, 5  ;;  %v1042_v40 = vshrl.u32 (!%p390_p13), %v1041_v34, 7 }
  0x33   : > { %3010 = vmatmul.mubr.msk.f32.vlgmr.msra.gmra.mrb[0].mxu1 (!%p390_p13), %vm456_vm2, %v2870_v12  ;;  %3013 = vmatpush3.msk.msra.mxu0 (!%p390_p13), %vm460_vm0, %v3443_v10  ;;  %v1671_v20 = vld [vmem:[%s3724_s4] sm:$0xf] (!%p390_p13)  ;;  %v2908_v22 = vld [vmem:[%s3724_s4 + $0x8] sm:$0xf] (!%p390_p13)  ;;  %s3600_s19 = scalar_lea.vmem (!%p390_p13), [#allocation4], %s2866_s18  ;;  %vm2718_vm4 = vcmask (!%p390_p13), 60416  }
  0x34   : > { %3014 = vmatprep.mubr.msk.f32.mxu0 (!%p390_p13), %vm3303_vm1, %v3302_v8  ;;  %3017 = vmatprep.subr.mxu1 (!%p390_p13), %v3302_v8  ;;  %v1967_v23 = vld [vmem:[%s3600_s19] sm:$0xff] (!%p390_p13)  ;;  %v3605_v24 = vld [vmem:[%s3600_s19 + $0x10] sm:$0xff] (!%p390_p13)  ;;  %v1043_v43 = vsub.s32 (!%p390_p13), 0, %v1042_v40  ;;  %v1350_v60 = vsub.s32 (!%p390_p13), 1, %v1042_v40  ;;  %s446_s12 = scalar_lea.vmem (!%p390_p13), [#allocation5], %s3432_s20  ;;  %s2938_s14 = sshll.u32 (!%p390_p13), %s3292_s24, 6 }
  0x35   : > { %3018 = vmatpush3.msk.msra.mxu1 %vm460_vm0, %v3445_v11  ;;  %3019 = vmatprep.mubr.msk.f32.mxu1 %vm3303_vm1, %v3302_v8  ;;  %v2118_v25 = vadd.f32 %v3605_v24, %v1967_v23  ;;  %s2736_s13 = sshll.u32 %s446_s12, 4  ;;  %s3671_s17 = scalar_lea.hbm %s3726_s6, %s2938_s14  ;;  %s3666_s13 = int_to_ptr.vmem [resolvable:$true] %s2736_s13 }
  0x36   : > { %3015 = vmatmul.mubr.msk.f32.vlgmr.msra.gmra.mrb[2].mxu0 %vm456_vm2, %v2870_v12  ;;  %3022 = vmatprep.subr.mxu0 %v3302_v8  ;;  %v1044_v46 = vrot.slane %v3443_v10, %v1043_v43  ;;  %v1049_v47 = vrot.slane %v3445_v11, %v1043_v43  ;;  %v1351_v1 = vrot.slane %v3443_v10, %v1350_v60  ;;  %s2723_s20 = scalar_lea.sflag [#allocation6], %s3428_s7  ;;  %s3222_s18 = scalar_lea.vmem %s3666_s13, 128 }
  0x37   : > { %3020 = vmatmul.mubr.msk.f32.vlgmr.msra.gmra.mrb[2].mxu1 %vm456_vm2, %v453_v9  ;;  %3023 = vmatpush3.msk.msra.mxu0 %vm460_vm0, %v3443_v10  ;;  %v1356_v2 = vrot.slane %v3445_v11, %v1350_v60  ;;  %p3223_p0 = scmp.ne.s32.totalorder %s3666_s13, %s3222_s18  ;;  %s3304_s24 = smov [#allocation5]  }
  0x38   : > { %3024 = vmatprep.mubr.msk.f32.mxu0 %vm3303_vm1, %v3302_v8  ;;  %3027 = vmatprep.subr.mxu1 %v3302_v8 }
  0x39   : > { %3028 = vmatpush3.msk.msra.mxu1 %vm460_vm0, %v3445_v11  ;;  %3029 = vmatprep.mubr.msk.f32.mxu1 %vm3303_vm1, %v3302_v8  ;;  %p3224_p1 = pnand %p3223_p0, %p3386_p5 }
  0x3a   : > { %3025 = vmatmul.mubr.msk.f32.vlgmr.msra.gmra.mrb[4].mxu0 %vm456_vm2, %v751_v13  ;;  %3032 = vmatprep.subr.mxu0 %v3302_v8 }
  0x3b   : > { %3030 = vmatmul.mubr.msk.f32.vlgmr.msra.gmra.mrb[4].mxu1 %vm456_vm2, %v2879_v14  ;;  %3033 = vmatpush3.msk.msra.mxu0 %vm460_vm0, %v3443_v10  ;;  %p3225_p2 = pneg %p3224_p1 }
  0x3c   : > { %3034 = vmatprep.mubr.msk.f32.mxu0 %vm3303_vm1, %v3302_v8  ;;  %3037 = vmatprep.subr.mxu0 %v3302_v8 }
  0x3d   : > { %3042 = vmatprep.subr.mxu1 %v3302_v8  ;;  %3044 = vmatprep.mubr.msk.f32.mxu1 %vm3303_vm1, %v3302_v8 }
  0x3e   : > { %3035 = vmatmul.mubr.msk.f32.vlgmr.msra.gmra.mrb[6].mxu0 %vm456_vm2, %v2879_v14  ;;  %3043 = vmatpush3.msk.msra.mxu1 %vm460_vm0, %v3443_v10 }
  0x3f   : > { %3038 = vmatpush3.msk.msra.mxu0 %vm460_vm0, %v3445_v11  ;;  %3039 = vmatprep.mubr.msk.f32.mxu0 %vm3303_vm1, %v3302_v8 }
  0x40   : > { %3052 = vmatprep.subr.mxu0 %v3302_v8  ;;  %3045 = vmatmul.mubr.msk.f32.vlgmr.msra.gmra.mrb[6].mxu1 %vm456_vm2, %v2888_v15 }
  0x41   : > { %3047 = vmatprep.subr.mxu1 %v3302_v8  ;;  %3049 = vmatprep.mubr.msk.f32.mxu1 %vm3303_vm1, %v3302_v8 }
  0x42   : > { %3048 = vmatpush3.msk.msra.mxu1 %vm460_vm0, %v3445_v11 }
  0x43   : > { %3062 = vmatprep.subr.mxu1 %v3302_v8 }
  0x44   : > { %3050 = vmatmul.mubr.msk.f32.vlgmr.msra.gmra.mrb[8].mxu1 %vm456_vm2, %v2889_v16 }
  0x45   : > { %3063 = vmatpush3.msk.msra.mxu1 %vm460_vm0, %v3443_v10  ;;  %3064 = vmatprep.mubr.msk.f32.mxu1 %vm3303_vm1, %v3302_v8 }
  0x46   : > { %3040 = vmatmul.mubr.msk.f32.vlgmr.msra.gmra.mrb[6].mxu0 %vm456_vm2, %v751_v13  ;;  %3067 = vmatprep.subr.mxu1 %v3302_v8 }
  0x47   : > { %3053 = vmatpush3.msk.msra.mxu0 %vm460_vm0, %v3443_v10  ;;  %3054 = vmatprep.mubr.msk.f32.mxu0 %vm3303_vm1, %v3302_v8 }
  0x48   : > { %3057 = vmatprep.subr.mxu0 %v3302_v8  ;;  %3065 = vmatmul.mubr.msk.f32.vlgmr.msra.gmra.mrb[10].mxu1 %vm456_vm2, %v2898_v17 }
  0x49   : > { %3068 = vmatpush3.msk.msra.mxu1 %vm460_vm0, %v3445_v11  ;;  %3069 = vmatprep.mubr.msk.f32.mxu1 %vm3303_vm1, %v3302_v8 }
  0x4a   : > { %3055 = vmatmul.mubr.msk.f32.vlgmr.msra.gmra.mrb[8].mxu0 %vm456_vm2, %v2889_v16  ;;  %3082 = vmatprep.subr.mxu1 %v3302_v8 }
  0x4b   : > { %3058 = vmatpush3.msk.msra.mxu0 %vm460_vm0, %v3445_v11  ;;  %3059 = vmatprep.mubr.msk.f32.mxu0 %vm3303_vm1, %v3302_v8 }
  0x4c   : > { %3072 = vmatprep.subr.mxu0 %v3302_v8  ;;  %3070 = vmatmul.mubr.msk.f32.vlgmr.msra.gmra.mrb[12].mxu1 %vm456_vm2, %v2899_v18 }
  0x4d   : > { %3083 = vmatpush3.msk.msra.mxu1 %vm460_vm0, %v3542_v19  ;;  %3084 = vmatprep.mubr.msk.f32.mxu1 %vm3303_vm1, %v3302_v8 }
  0x4e   : > { %3087 = vmatprep.subr.mxu1 %v3302_v8 }
  0x50   : > { %3085 = vmatmul.mubr.msk.f32.vlgmr.msra.gmra.mrb[14].mxu1 %vm456_vm2, %v1671_v20 }
  0x51   : > { %3088 = vmatpush3.msk.msra.mxu1 %vm460_vm0, %v3558_v21  ;;  %3089 = vmatprep.mubr.msk.f32.mxu1 %vm3303_vm1, %v3302_v8 }
  0x52   : > { %3060 = vmatmul.mubr.msk.f32.vlgmr.msra.gmra.mrb[8].mxu0 %vm456_vm2, %v2888_v15  ;;  %3102 = vmatprep.subr.mxu1 %v3302_v8 }
  0x53   : > { %3073 = vmatpush3.msk.msra.mxu0 %vm460_vm0, %v3443_v10  ;;  %3074 = vmatprep.mubr.msk.f32.mxu0 %vm3303_vm1, %v3302_v8 }
  0x54   : > { %3077 = vmatprep.subr.mxu0 %v3302_v8  ;;  %3090 = vmatmul.mubr.msk.f32.vlgmr.msra.gmra.mrb[16].mxu1 %vm456_vm2, %v2908_v22 }
  0x55   : > { %3104 = vmatprep.mubr.msk.f32.mxu1 %vm3303_vm1, %v3302_v8  ;;  %3103 = vmatpush3.msra.mxu1 %v1967_v23 }
  0x56   : > { %3075 = vmatmul.mubr.msk.f32.vlgmr.msra.gmra.mrb[10].mxu0 %vm456_vm2, %v2899_v18  ;;  %3107 = vmatprep.subr.mxu1 %v3302_v8 }
  0x57   : > { %3078 = vmatpush3.msk.msra.mxu0 %vm460_vm0, %v3445_v11  ;;  %3079 = vmatprep.mubr.msk.f32.mxu0 %vm3303_vm1, %v3302_v8 }
  0x58   : > { %3092 = vmatprep.subr.mxu0 %v3302_v8 }
  0x5e   : > { %3080 = vmatmul.mubr.msk.f32.vlgmr.msra.gmra.mrb[10].mxu0 %vm456_vm2, %v2898_v17 }
  0x5f   : > { %3093 = vmatpush3.msk.msra.mxu0 %vm460_vm0, %v3542_v19  ;;  %3094 = vmatprep.mubr.msk.f32.mxu0 %vm3303_vm1, %v3302_v8 }
  0x60   : > { %3097 = vmatprep.subr.mxu0 %v3302_v8 }
  0x62   : > { %3095 = vmatmul.mubr.msk.f32.vlgmr.msra.gmra.mrb[12].mxu0 %vm456_vm2, %v2908_v22 }
  0x63   : > { %3098 = vmatpush3.msk.msra.mxu0 %vm460_vm0, %v3558_v21  ;;  %3099 = vmatprep.mubr.msk.f32.mxu0 %vm3303_vm1, %v3302_v8 }
  0x64   : > { %3112 = vmatprep.subr.mxu0 %v3302_v8 }
  0x6a   : > { %3100 = vmatmul.mubr.msk.f32.vlgmr.msra.gmra.mrb[12].mxu0 %vm456_vm2, %v1671_v20 }
  0x6b   : > { %3114 = vmatprep.mubr.msk.f32.mxu0 %vm3303_vm1, %v3302_v8  ;;  %3113 = vmatpush3.msra.mxu0 %v2118_v25 }
  0x6c   : > { %3122 = vmatprep.subr.mxu0 %v3302_v8 }
 0x105   : > { %v530_v26 = vpop.f32.mrb[0].mxu0 }
 0x106   : > { %v3006_v27 = vpop.f32.mrb[1].mxu0  ;;  %v606_v28 = vpop.f32.mrb[0].mxu1 }
 0x107   : > { %v610_v29 = vsub.f32 %v530_v26, %v606_v28  ;;  %v3011_v30 = vpop.f32.mrb[1].mxu1  ;;  %v1657_v26 = vsub.s32 2, %v1042_v40 }
 0x109   : > { %v677_v31 = vpop.f32.mrb[2].mxu0  ;;  %v1658_v27 = vrot.slane %v3443_v10, %v1657_v26  ;;  %v1663_v28 = vrot.slane %v3445_v11, %v1657_v26  ;;  %v2921_v10 = vld [vmem:[%s3724_s4 + $0x4] sm:$0xf]  ;;  %v2922_v11 = vld [vmem:[%s3724_s4 + $0xc] sm:$0xf] }
 0x10a   : > { %v3016_v32 = vpop.f32.mrb[3].mxu0  ;;  %v747_v33 = vpop.f32.mrb[2].mxu1 }
 0x10b   : > { %v748_v35 = vadd.f32 %v747_v33, %v677_v31  ;;  %v3021_v36 = vpop.f32.mrb[3].mxu1 }
 0x10d   : > { %v823_v37 = vpop.f32.mrb[4].mxu0 }
 0x10e   : > { %v3026_v38 = vpop.f32.mrb[5].mxu0  ;;  %v896_v39 = vpop.f32.mrb[4].mxu1 }
 0x10f   : > { %v900_v41 = vsub.f32 %v823_v37, %v896_v39  ;;  %v3031_v42 = vpop.f32.mrb[5].mxu1 }
 0x111   : > { %v1045_v52 = vmul.f32 %v1044_v46, %v900_v41  ;;  %v1053_v53 = vmul.f32 %v1049_v47, %v900_v41  ;;  %v2932_v41 = vld [vmem:[%s3600_s19 + $0x18] sm:$0xff] }
 0x113   : > { %v1130_v44 = vpop.f32.mrb[6].mxu1 }
 0x114   : > { %v3046_v45 = vpop.f32.mrb[7].mxu1 }
 0x117   : > { %v1203_v48 = vpop.f32.mrb[8].mxu1 }
 0x118   : > { %v1207_v49 = vsub.f32 %v1130_v44, %v1203_v48  ;;  %v3051_v50 = vpop.f32.mrb[9].mxu1 }
 0x119   : > { %v1037_v51 = vpop.f32.mrb[6].mxu0 }
 0x11a   : > { %v1050_v54 = vmul.f32 %v1049_v47, %v1037_v51  ;;  %v1054_v55 = vmul.f32 %v1044_v46, %v1037_v51  ;;  %v3041_v56 = vpop.f32.mrb[7].mxu0  ;;  %v1352_v6 = vmul.f32 %v1351_v1, %v1207_v49  ;;  %v1360_v7 = vmul.f32 %v1356_v2, %v1207_v49 }
 0x11b   : > { %v1437_v57 = vpop.f32.mrb[10].mxu1 }
 0x11c   : > { %v1051_v58 = vsub.f32 %v1045_v52, %v1050_v54  ;;  %v1055_v59 = vadd.f32 %v1054_v55, %v1053_v53  ;;  %v3066_v61 = vpop.f32.mrb[11].mxu1 }
 0x11e   : > { %v1052_v62 = vadd.f32 %v1051_v58, %v610_v29  ;;  %v1056_v63 = vadd.f32 %v1055_v59, %v748_v35 }
 0x11f   : > { %v1510_v0 = vpop.f32.mrb[12].mxu1 }
 0x120   : > { %v1514_v3 = vsub.f32 %v1437_v57, %v1510_v0  ;;  %v3071_v4 = vpop.f32.mrb[13].mxu1 }
 0x122   : > { %v1659_v30 = vmul.f32 %v1658_v27, %v1514_v3  ;;  %v1667_v31 = vmul.f32 %v1663_v28, %v1514_v3 }
 0x123   : > { %v1746_v5 = vpop.f32.mrb[14].mxu1 }
 0x124   : > { %v3086_v9 = vpop.f32.mrb[15].mxu1 }
 0x125   : > { %v1344_v12 = vpop.f32.mrb[8].mxu0 }
 0x126   : > { %v1357_v13 = vmul.f32 %v1356_v2, %v1344_v12  ;;  %v1361_v14 = vmul.f32 %v1351_v1, %v1344_v12  ;;  %v3061_v15 = vpop.f32.mrb[9].mxu0 }
 0x127   : > { %v1822_v16 = vpop.f32.mrb[16].mxu1 }
 0x128   : > { %v1358_v17 = vsub.f32 %v1352_v6, %v1357_v13  ;;  %v1362_v18 = vadd.f32 %v1361_v14, %v1360_v7  ;;  %v1826_v20 = vsub.f32 %v1746_v5, %v1822_v16  ;;  %v3091_v22 = vpop.f32.mrb[17].mxu1 }
 0x12a   : > { %v1359_v23 = vadd.f32 %v1358_v17, %v1052_v62  ;;  %v1363_v25 = vadd.f32 %v1362_v18, %v1056_v63  ;;  %3105 = vmatmul.mubr.msk.f32.vlgmr.msra.gmra.mrb[18].mxu1 %vm1971_vm3, %v1826_v20 }
 0x12b   : > { %3108 = vmatpush3.msra.mxu1 %v3605_v24  ;;  %3109 = vmatprep.mubr.msk.f32.mxu1 %vm3303_vm1, %v3302_v8 }
 0x12c   : > { %3117 = vmatprep.subr.mxu1 %v3302_v8 }
 0x131   : > { %v1651_v29 = vpop.f32.mrb[10].mxu0 }
 0x132   : > { %v1664_v32 = vmul.f32 %v1663_v28, %v1651_v29  ;;  %v1668_v33 = vmul.f32 %v1658_v27, %v1651_v29  ;;  %v3081_v34 = vpop.f32.mrb[11].mxu0 }
 0x134   : > { %v1665_v35 = vsub.f32 %v1659_v30, %v1664_v32  ;;  %v1669_v36 = vadd.f32 %v1668_v33, %v1667_v31 }
 0x136   : > { %v1670_v37 = vadd.f32 %v1669_v36, %v1363_v25  ;;  %v1666_v38 = vadd.f32 %v1665_v35, %v1359_v23 }
 0x13d   : > { %v1963_v24 = vpop.f32.mrb[12].mxu0 }
 0x13e   : > { %v1970_v39 = vadd.f32 %v1963_v24, %v1826_v20  ;;  %v3101_v40 = vpop.f32.mrb[13].mxu0  ;;  %3110 = vmatmul.mubr.msk.f32.vlgmr.msra.gmra.mrb[20].mxu1 %vm1971_vm3, %v1963_v24 }
 0x13f   : > { %3118 = vmatpush3.msk.msra.mxu1 %vm460_vm0, %v3542_v19  ;;  %3119 = vmatprep.mubr.msk.f32.mxu1 %vm3303_vm1, %v3302_v8 }
 0x140   : > { %3115 = vmatmul.mubr.msk.f32.vlgmr.msra.gmra.mrb[14].mxu0 %vm1971_vm3, %v1970_v39  ;;  %3127 = vmatprep.subr.mxu1 %v3302_v8 }
 0x141   : > { %3123 = vmatpush3.msk.msra.mxu0 %vm460_vm0, %v3558_v21  ;;  %3124 = vmatprep.mubr.msk.f32.mxu0 %vm3303_vm1, %v3302_v8 }
 0x142   : > { %3120 = vmatmul.mubr.msk.f32.vlgmr.msra.gmra.mrb[22].mxu1 %vm456_vm2, %v2921_v10  ;;  %3137 = vmatprep.subr.mxu0 %v3302_v8 }
 0x143   : > { %3128 = vmatpush3.msk.msra.mxu1 %vm460_vm0, %v3542_v19  ;;  %3129 = vmatprep.mubr.msk.f32.mxu1 %vm3303_vm1, %v3302_v8  ;;  %v2931_v19 = vld [vmem:[%s3600_s19 + $0x8] sm:$0xff]  ;;  %s3226_s19 = sshll.u32 %s3304_s24, 4  ;;  %s3227_s19 = int_to_ptr.vmem [resolvable:$false] %s3226_s19 }
 0x144   : > { %3125 = vmatmul.mubr.msk.f32.vlgmr.msra.gmra.mrb[16].mxu0 %vm456_vm2, %v2922_v11  ;;  %3132 = vmatprep.subr.mxu1 %v3302_v8  ;;  %v2639_v42 = vadd.f32 %v2932_v41, %v2931_v19  ;;  %s3228_s27 = scalar_lea.vmem %s3227_s19, 256  ;;  %p3229_p3 = scmp.lt.s32.totalorder %s3666_s13, %s3227_s19 }
 0x145   : > { %3139 = vmatprep.mubr.msk.f32.mxu0 %vm3303_vm1, %v3302_v8  ;;  %3138 = vmatpush3.msra.mxu0 %v2931_v19  ;;  %p3230_p4 = scmp.lt.s32.totalorder %s3228_s27, %s3222_s18 }
 0x146   : > { %3130 = vmatmul.mubr.msk.f32.vlgmr.msra.gmra.mrb[24].mxu1 %vm456_vm2, %v2922_v11  ;;  %3142 = vmatprep.subr.mxu0 %v3302_v8 }
 0x147   : > { %3133 = vmatpush3.msk.msra.mxu1 %vm460_vm0, %v3558_v21  ;;  %3134 = vmatprep.mubr.msk.f32.mxu1 %vm3303_vm1, %v3302_v8  ;;  %p3231_p6 = por %p3230_p4, %p3229_p3 }
 0x148   : > { %3147 = vmatprep.subr.mxu1 %v3302_v8 }
 0x149   : > { %p3232_p7 = pnand %p3231_p6, %p3225_p2 }
 0x14e   : > { %3135 = vmatmul.mubr.msk.f32.vlgmr.msra.gmra.mrb[24].mxu1 %vm456_vm2, %v2921_v10 }
 0x14f   : > { %3149 = vmatprep.mubr.msk.f32.mxu1 %vm3303_vm1, %v3302_v8  ;;  %3148 = vmatpush3.msra.mxu1 %v2639_v42 }
 0x1fd   : > { %v2041_v43 = vpop.f32.mrb[18].mxu1 }
 0x1fe   : > { %v3106_v44 = vpop.f32.mrb[19].mxu1 }
 0x211   : > { %v2114_v21 = vpop.f32.mrb[20].mxu1 }
 0x212   : > { %v2192_v45 = vsub.f32 %v2041_v43, %v2114_v21  ;;  %v3111_v46 = vpop.f32.mrb[21].mxu1 }
 0x213   : > { %v2188_v47 = vpop.f32.mrb[14].mxu0 }
 0x214   : > { %v2193_v48 = vadd.f32 %v2192_v45, %v1666_v38  ;;  %v2194_v49 = vsub.f32 %v2188_v47, %v2041_v43  ;;  %v3116_v50 = vpop.f32.mrb[15].mxu0 }
 0x215   : > { %v2270_v51 = vpop.f32.mrb[22].mxu1 }
 0x216   : > { %v2195_v52 = vsub.f32 %v2194_v49, %v2114_v21  ;;  %v3121_v53 = vpop.f32.mrb[23].mxu1 }
 0x217   : > { %v2343_v54 = vpop.f32.mrb[16].mxu0 }
 0x218   : > { %v2196_v55 = vadd.f32 %v2195_v52, %v1670_v37  ;;  %v2347_v56 = vsub.f32 %v2270_v51, %v2343_v54  ;;  %v3126_v57 = vpop.f32.mrb[17].mxu0 }
 0x21a   : > { %3140 = vmatmul.mubr.msk.f32.vlgmr.msra.gmra.mrb[18].mxu0 %vm1971_vm3, %v2347_v56 }
 0x21b   : > { %3143 = vmatpush3.msra.mxu0 %v2932_v41  ;;  %3144 = vmatprep.mubr.msk.f32.mxu0 %vm3303_vm1, %v3302_v8 }
 0x221   : > { %v2484_v58 = vpop.f32.mrb[24].mxu1 }
 0x222   : > { %v2492_v59 = vadd.f32 %v2484_v58, %v2347_v56  ;;  %v3136_v60 = vpop.f32.mrb[25].mxu1  ;;  %3145 = vmatmul.mubr.msk.f32.vlgmr.msra.gmra.mrb[20].mxu0 %vm1971_vm3, %v2484_v58 }
 0x224   : > { %3150 = vmatmul.mubr.msk.f32.vlgmr.msra.gmra.mrb[26].mxu1 %vm1971_vm3, %v2492_v59 }
 0x2ed   : > { %v2562_v61 = vpop.f32.mrb[18].mxu0 }
 0x2ee   : > { %v3141_v62 = vpop.f32.mrb[19].mxu0 }
 0x2f5   : > { %v2635_v63 = vpop.f32.mrb[20].mxu0 }
 0x2f6   : > { %v2713_v0 = vsub.f32 %v2562_v61, %v2635_v63  ;;  %v3146_v1 = vpop.f32.mrb[21].mxu0 }
 0x2f7   : > { %v2709_v2 = vpop.f32.mrb[26].mxu1 }
 0x2f8   : > { %v2714_v8 = vadd.f32 %v2713_v0, %v2193_v48  ;;  %v2715_v3 = vsub.f32 %v2709_v2, %v2562_v61  ;;  %v3151_v4 = vpop.f32.mrb[27].mxu1 }
 0x2fa   : > { %2719 = vst.msk [vmem:[%s446_s12] sm:$0xf] %vm2718_vm4, %v2714_v8  ;;  %v2716_v5 = vsub.f32 %v2715_v3, %v2635_v63 }
 0x2fc   : > { %v2717_v6 = vadd.f32 %v2716_v5, %v2196_v55 }
 0x2fe   : > { %2936 = vst.msk [vmem:[%s446_s12 + $0x4] sm:$0xf] %vm2718_vm4, %v2717_v6 }
 0x2ff   : > { %3235 = shalt.err (!%p3232_p7)
}
 0x300   : > { %s3236_s28 = scalar_lea.hbm %s3671_s17, 128  ;;  %s3240_s12 = scalar_lea.hbm %s3726_s6, 256 }
 0x301   : > { %p3237_p8 = scmp.ne.s32.totalorder %s3671_s17, %s3236_s28  ;;  %p3241_p13 = scmp.lt.u32.totalorder %s3671_s17, %s3726_s6 }
 0x302   : > { %p3242_p0 = scmp.lt.u32.totalorder %s3240_s12, %s3236_s28  ;;  %p3244_p2 = scmp.lt.u32.totalorder %s3236_s28, %s3671_s17 }
 0x303   : > { %p3238_p11 = pnand %p3237_p8, %p3386_p5 }
 0x304   : > { %p3243_p1 = por %p3242_p0, %p3241_p13 }
 0x305   : > { %p3239_p12 = pneg %p3238_p11 }
 0x306   : > { %p3245_p3 = por %p3244_p2, %p3243_p1 }
 0x308   : > { %p3246_p4 = pnand %p3245_p3, %p3239_p12 }
 0x30a   : > { %3249 = shalt.err (!%p3246_p4)
}
 0x30b   : > { %s3305_s16 = smov 64   ;;  %s3306_s18 = smov 128  }
 0x30c   : > { %s3307_s24 = smov 4  }
 0x30d   : > { %3162 = dma.vmem_to_hbm [thread:$0]  (%p3386_p5), %s3666_s13, 128, %s3671_s17, %s2723_s20, %s3305_s16, %s3306_s18, %s3307_s24  }
 0x30e PF: > { %s2751_s19 = sand.u32 1, %s3280_s21   ;;  %p3165_p6 = pnand %p2855_p10, %p3397_p9 }
 0x30f   : > { %s2752_s27 = scalar_lea.sflag [#allocation6], %s2751_s19 }
 0x310   : > { %3275 = dma.done.wait (!%p3165_p6), %s2752_s27, 128  }
 0x311   : > { %3277 = vsyncadd (!%p3165_p6), %s2752_s27, 4294967168  ;;  %s19_s26 = sadd.s32 1, %s3300_s26   ;;  %s3730_s21 = smov %s3284_s22 }
 0x312   : > { %p16_p7 = scmp.ge.s32.totalorder %s19_s26, 4   ;;  %s3731_s22 = smov %s3288_s23 }
 0x313   : > { %s3732_s23 = smov %s3395_s10  ;;  %s3733_s24 = smov %s3296_s25 }
 0x314   : > { %s3734_s25 = smov %s3736_s29  ;;  %18 = sbr.rel (!%p16_p7) target bundleno = 4 (0x4), region = 235 }
 0x31b   :  { %2757 = vsyncpa [#allocation6], 1 }
 0x31c   :  { %2759 = vsyncpa [#allocation6 + $0x1], 1 }

</bundles_post_ra>
